<compile_context>
chip_gen: v6e
topology: v6e:2x2x1
jax: 0.10.0
libtpu: 0.0.40
codegen_flags: <defaults>
</compile_context>

<pallas_src>
import functools

import jax
import jax.numpy as jnp
from jax.experimental import pallas as pl
from jax.experimental.pallas import tpu as pltpu


def _round_up(x, m):
    return ((x + m - 1) // m) * m


def _tdss_kernel(x_ref, wf_ref, bf_ref, wh_ref, bh_ref, stains_ref, dens_ref,
                 *, n_stains):
    # Channel-major: channels on sublanes, pixels on lanes (dense vregs/stores).
    x = x_ref[0].astype(jnp.float32)                                # (Cin, TP)

    # ---- feature_net: 1x1 conv + ReLU ----
    z = jnp.dot(wf_ref[...], x, preferred_element_type=jnp.float32) + bf_ref[...]
    z = jnp.maximum(z, 0.0)                                         # (Cf, TP)

    # ---- fused ColourNet + DensityNet heads (alpha already folded in) ----
    h = jnp.dot(wh_ref[...], z, preferred_element_type=jnp.float32) + bh_ref[...]
    s3 = n_stains * 3
    c_logits = h[:s3, :]                                            # (S*3, TP)
    d_logits = h[s3:, :]                                            # (S,   TP)

    # sigmoid(x) = 0.5 * (tanh(x/2) + 1)  -> single EUP transcendental
    colours = 0.5 * jnp.tanh(0.5 * c_logits) + 0.5                  # (S*3, TP)
    # stable softplus: max(x, 0) + log1p(exp(-|x|))
    dens = jnp.maximum(d_logits, 0.0) + jnp.log1p(jnp.exp(-jnp.abs(d_logits)))
    dens_ref[0] = dens.astype(dens_ref.dtype)                       # (S, TP)

    # ---- reconstruct_stains: stain_i = colours_i * densities_i ----
    # sublane-sliced broadcast multiply; all stores are full lane-width.
    for i in range(n_stains):
        stains_ref[0, i * 3:(i + 1) * 3, :] = (
            colours[i * 3:(i + 1) * 3, :] * dens[i:i + 1, :]
        ).astype(stains_ref.dtype)


def tdss_forward(x_nchw, params, *, n_stains, alpha, tile_p=4096,
                 out_dtype=jnp.float32):
    """Returns (list of per-stain reconstructions (B,3,H,W), densities (B,S,H,W)).

    Weights follow the PyTorch 1x1-conv convention (out_ch, in_ch):
      wf: (Cf, Cin), bf: (Cf,), wc: (S*3, Cf), bc: (S*3,), wd: (S, Cf), bd: (S,)
    `out_dtype=jnp.bfloat16` halves HBM writeback on bandwidth-starved chips
    (v5e) if downstream tolerates it.
    """
    B, Cin, H, W = x_nchw.shape
    HW = H * W
    Cf = params["wf"].shape[0]
    s3 = n_stains * 3

    # Pick the largest lane tile that fits the image, multiple of 128; pad HW.
    tile = _round_up(min(tile_p, _round_up(HW, 128)), 128)
    HW_pad = _round_up(HW, tile)

    # NCHW -> (B, Cin, H*W) is a pure view (no transpose, no HBM traffic).
    x = x_nchw.reshape(B, Cin, HW)
    if HW_pad != HW:
        x = jnp.pad(x, ((0, 0), (0, 0), (0, HW_pad - HW)))

    wf = params["wf"].astype(jnp.float32)                           # (Cf, Cin)
    bf = params["bf"].astype(jnp.float32).reshape(Cf, 1)
    # Fold alpha into the colour head; fuse colour+density heads into one matmul.
    wh = jnp.concatenate(
        [alpha * params["wc"], params["wd"]], axis=0).astype(jnp.float32)  # (S*4, Cf)
    bh = jnp.concatenate(
        [alpha * params["bc"], params["bd"]], axis=0).astype(jnp.float32
        ).reshape(s3 + n_stains, 1)

    kernel = functools.partial(_tdss_kernel, n_stains=n_stains)
    grid = (B, HW_pad // tile)

    stains_cm, dens_cm = pl.pallas_call(
        kernel,
        out_shape=(
            jax.ShapeDtypeStruct((B, s3, HW_pad), out_dtype),
            jax.ShapeDtypeStruct((B, n_stains, HW_pad), out_dtype),
        ),
        grid_spec=pltpu.PrefetchScalarGridSpec(
            num_scalar_prefetch=0,
            grid=grid,
            in_specs=[
                pl.BlockSpec((1, Cin, tile), lambda b, j: (b, 0, j)),
                pl.BlockSpec((Cf, Cin), lambda b, j: (0, 0)),
                pl.BlockSpec((Cf, 1), lambda b, j: (0, 0)),
                pl.BlockSpec((s3 + n_stains, Cf), lambda b, j: (0, 0)),
                pl.BlockSpec((s3 + n_stains, 1), lambda b, j: (0, 0)),
            ],
            out_specs=[
                pl.BlockSpec((1, s3, tile), lambda b, j: (b, 0, j)),
                pl.BlockSpec((1, n_stains, tile), lambda b, j: (b, 0, j)),
            ],
        ),
        compiler_params=pltpu.CompilerParams(
            dimension_semantics=("parallel", "parallel")),
    )(x, wf, bf, wh, bh)

    # All post-processing below is pure views / slices (no HBM transposes).
    stains_all = stains_cm[:, :, :HW].reshape(B, n_stains, 3, H, W)
    densities = dens_cm[:, :, :HW].reshape(B, n_stains, H, W)
    reconstructed_stains = [stains_all[:, i] for i in range(n_stains)]  # (B,3,H,W)
    return reconstructed_stains, densities


def tdss_reference(x_nchw, params, *, n_stains, alpha):
    """Pure-JAX reference with identical semantics (for validation)."""
    B, Cin, H, W = x_nchw.shape
    x = x_nchw.reshape(B, Cin, H * W)
    z = jnp.maximum(
        jnp.einsum("fc,bcp->bfp", params["wf"], x) + params["bf"][None, :, None], 0.0)
    c_log = jnp.einsum("oc,bcp->bop", params["wc"], z) + params["bc"][None, :, None]
    colours = jax.nn.sigmoid(alpha * c_log)                         # (B, S*3, P)
    d_log = jnp.einsum("oc,bcp->bop", params["wd"], z) + params["bd"][None, :, None]
    dens = jax.nn.softplus(d_log)                                   # (B, S, P)
    colours = colours.reshape(B, n_stains, 3, H, W)
    dens = dens.reshape(B, n_stains, H, W)
    stains = [colours[:, i] * dens[:, i:i + 1] for i in range(n_stains)]
    return stains, dens


if __name__ == "__main__":
    # Small deterministic config
    B, Cin, H, W = 2, 3, 16, 16
    feature_channels = 32
    n_stains = 2
    alpha = 1.5

    key = jax.random.PRNGKey(0)
    k = jax.random.split(key, 7)
    params = {
        "wf": 0.1 * jax.random.normal(k[0], (feature_channels, Cin), jnp.float32),
        "bf": 0.1 * jax.random.normal(k[1], (feature_channels,), jnp.float32),
        "wc": 0.1 * jax.random.normal(k[2], (n_stains * 3, feature_channels), jnp.float32),
        "bc": 0.1 * jax.random.normal(k[3], (n_stains * 3,), jnp.float32),
        "wd": 0.1 * jax.random.normal(k[4], (n_stains, feature_channels), jnp.float32),
        "bd": 0.1 * jax.random.normal(k[5], (n_stains,), jnp.float32),
    }
    x = jax.random.normal(k[6], (B, Cin, H, W), jnp.float32)

    stains, densities = tdss_forward(x, params, n_stains=n_stains, alpha=alpha)
    jax.block_until_ready((stains, densities))

    ref_stains, ref_dens = tdss_reference(x, params, n_stains=n_stains, alpha=alpha)
    for s, rs in zip(stains, ref_stains):
        assert s.shape == (B, 3, H, W)
        assert jnp.allclose(s, rs, atol=1e-5, rtol=1e-5)
    assert densities.shape == (B, n_stains, H, W)
    assert jnp.allclose(densities, ref_dens, atol=1e-5, rtol=1e-5)

    print("KERNEL_OK")
</pallas_src>

<mosaic_0001>
module attributes {stable_mosaic.version = 11 : i64} {
  func.func @_tdss_kernel(%arg0: i32, %arg1: i32, %arg2: memref<1x3x256xf32, #tpu.memory_space<vmem>>, %arg3: memref<32x3xf32, #tpu.memory_space<vmem>>, %arg4: memref<32x1xf32, #tpu.memory_space<vmem>>, %arg5: memref<8x32xf32, #tpu.memory_space<vmem>>, %arg6: memref<8x1xf32, #tpu.memory_space<vmem>>, %arg7: memref<1x6x256xf32, #tpu.memory_space<vmem>>, %arg8: memref<1x2x256xf32, #tpu.memory_space<vmem>>) attributes {dimension_semantics = [#tpu.dimension_semantics<parallel>, #tpu.dimension_semantics<parallel>], iteration_bounds = array<i64: 2, 1>, scalar_prefetch = 0 : i64, scratch_operands = 0 : i64, tpu.core_type = #tpu.core_type<tc>, window_params = [{transform_indices = @transform_0, window_bounds = array<i64: 1, 3, 256>}, {pipeline_mode = #tpu.pipeline_mode<synchronous>, transform_indices = @transform_1, window_bounds = array<i64: 32, 3>}, {pipeline_mode = #tpu.pipeline_mode<synchronous>, transform_indices = @transform_2, window_bounds = array<i64: 32, 1>}, {pipeline_mode = #tpu.pipeline_mode<synchronous>, transform_indices = @transform_3, window_bounds = array<i64: 8, 32>}, {pipeline_mode = #tpu.pipeline_mode<synchronous>, transform_indices = @transform_4, window_bounds = array<i64: 8, 1>}, {transform_indices = @transform_5, window_bounds = array<i64: 1, 6, 256>}, {transform_indices = @transform_6, window_bounds = array<i64: 1, 2, 256>}]} {
    %c0 = arith.constant 0 : index
    %c0_0 = arith.constant 0 : index
    %c0_1 = arith.constant 0 : index
    %0 = vector.load %arg2[%c0, %c0_0, %c0_1] : memref<1x3x256xf32, #tpu.memory_space<vmem>>, vector<1x3x256xf32>
    %1 = vector.shape_cast %0 : vector<1x3x256xf32> to vector<3x256xf32>
    %c0_2 = arith.constant 0 : index
    %c0_3 = arith.constant 0 : index
    %2 = vector.load %arg3[%c0_2, %c0_3] : memref<32x3xf32, #tpu.memory_space<vmem>>, vector<32x3xf32>
    %cst = arith.constant dense<0.000000e+00> : vector<32x256xf32>
    %3 = tpu.matmul %2, %1, %cst {dimension_numbers = #tpu.dot_dimension_numbers<[1], [0], [0], [1], [0, 0, 1, 1], [], []>} : vector<32x3xf32>, vector<3x256xf32>, vector<32x256xf32> -> vector<32x256xf32>
    %c0_4 = arith.constant 0 : index
    %c0_5 = arith.constant 0 : index
    %4 = vector.load %arg4[%c0_4, %c0_5] : memref<32x1xf32, #tpu.memory_space<vmem>>, vector<32x1xf32>
    %5 = vector.broadcast %4 : vector<32x1xf32> to vector<32x256xf32>
    %6 = arith.addf %3, %5 : vector<32x256xf32>
    %cst_6 = arith.constant 0.000000e+00 : f32
    %7 = vector.broadcast %cst_6 : f32 to vector<32x256xf32>
    %8 = arith.maximumf %6, %7 : vector<32x256xf32>
    %c0_7 = arith.constant 0 : index
    %c0_8 = arith.constant 0 : index
    %9 = vector.load %arg5[%c0_7, %c0_8] : memref<8x32xf32, #tpu.memory_space<vmem>>, vector<8x32xf32>
    %cst_9 = arith.constant dense<0.000000e+00> : vector<8x256xf32>
    %10 = tpu.matmul %9, %8, %cst_9 {dimension_numbers = #tpu.dot_dimension_numbers<[1], [0], [0], [1], [0, 0, 1, 1], [], []>} : vector<8x32xf32>, vector<32x256xf32>, vector<8x256xf32> -> vector<8x256xf32>
    %c0_10 = arith.constant 0 : index
    %c0_11 = arith.constant 0 : index
    %11 = vector.load %arg6[%c0_10, %c0_11] : memref<8x1xf32, #tpu.memory_space<vmem>>, vector<8x1xf32>
    %12 = vector.broadcast %11 : vector<8x1xf32> to vector<8x256xf32>
    %13 = arith.addf %10, %12 : vector<8x256xf32>
    %14 = vector.extract_strided_slice %13 {offsets = [0, 0], sizes = [6, 256], strides = [1, 1]} : vector<8x256xf32> to vector<6x256xf32>
    %15 = vector.extract_strided_slice %13 {offsets = [6, 0], sizes = [2, 256], strides = [1, 1]} : vector<8x256xf32> to vector<2x256xf32>
    %cst_12 = arith.constant 5.000000e-01 : f32
    %16 = vector.broadcast %cst_12 : f32 to vector<6x256xf32>
    %17 = arith.mulf %16, %14 : vector<6x256xf32>
    %18 = math.tanh %17 : vector<6x256xf32>
    %cst_13 = arith.constant 5.000000e-01 : f32
    %19 = vector.broadcast %cst_13 : f32 to vector<6x256xf32>
    %20 = arith.mulf %19, %18 : vector<6x256xf32>
    %cst_14 = arith.constant 5.000000e-01 : f32
    %21 = vector.broadcast %cst_14 : f32 to vector<6x256xf32>
    %22 = arith.addf %20, %21 : vector<6x256xf32>
    %cst_15 = arith.constant 0.000000e+00 : f32
    %23 = vector.broadcast %cst_15 : f32 to vector<2x256xf32>
    %24 = arith.maximumf %15, %23 : vector<2x256xf32>
    %25 = math.absf %15 : vector<2x256xf32>
    %cst_16 = arith.constant 0.000000e+00 : f32
    %26 = vector.broadcast %cst_16 : f32 to vector<2x256xf32>
    %27 = arith.subf %26, %25 : vector<2x256xf32>
    %28 = math.exp %27 : vector<2x256xf32>
    %29 = math.log1p %28 : vector<2x256xf32>
    %30 = arith.addf %24, %29 : vector<2x256xf32>
    %c0_17 = arith.constant 0 : index
    %c0_18 = arith.constant 0 : index
    %c0_19 = arith.constant 0 : index
    %31 = vector.load %arg8[%c0_17, %c0_18, %c0_19] : memref<1x2x256xf32, #tpu.memory_space<vmem>>, vector<1x2x256xf32>
    %32 = vector.shape_cast %31 : vector<1x2x256xf32> to vector<2x256xf32>
    %33 = vector.shape_cast %30 : vector<2x256xf32> to vector<1x2x256xf32>
    tpu.vector_store %arg8[%c0_17, %c0_18, %c0_19], %33 {strides = array<i32>} : memref<1x2x256xf32, #tpu.memory_space<vmem>>, vector<1x2x256xf32>,
    %34 = vector.extract_strided_slice %22 {offsets = [0, 0], sizes = [3, 256], strides = [1, 1]} : vector<6x256xf32> to vector<3x256xf32>
    %35 = vector.extract_strided_slice %30 {offsets = [0, 0], sizes = [1, 256], strides = [1, 1]} : vector<2x256xf32> to vector<1x256xf32>
    %36 = vector.broadcast %35 : vector<1x256xf32> to vector<3x256xf32>
    %37 = arith.mulf %34, %36 : vector<3x256xf32>
    %c0_20 = arith.constant 0 : index
    %c0_21 = arith.constant 0 : index
    %c0_22 = arith.constant 0 : index
    %38 = vector.load %arg7[%c0_20, %c0_21, %c0_22] : memref<1x6x256xf32, #tpu.memory_space<vmem>>, vector<1x3x256xf32>
    %39 = vector.shape_cast %38 : vector<1x3x256xf32> to vector<3x256xf32>
    %40 = vector.shape_cast %37 : vector<3x256xf32> to vector<1x3x256xf32>
    tpu.vector_store %arg7[%c0_20, %c0_21, %c0_22], %40 {strides = array<i32>} : memref<1x6x256xf32, #tpu.memory_space<vmem>>, vector<1x3x256xf32>,
    %41 = vector.extract_strided_slice %22 {offsets = [3, 0], sizes = [3, 256], strides = [1, 1]} : vector<6x256xf32> to vector<3x256xf32>
    %42 = vector.extract_strided_slice %30 {offsets = [1, 0], sizes = [1, 256], strides = [1, 1]} : vector<2x256xf32> to vector<1x256xf32>
    %43 = vector.broadcast %42 : vector<1x256xf32> to vector<3x256xf32>
    %44 = arith.mulf %41, %43 : vector<3x256xf32>
    %c0_23 = arith.constant 0 : index
    %c3 = arith.constant 3 : index
    %c0_24 = arith.constant 0 : index
    %45 = vector.load %arg7[%c0_23, %c3, %c0_24] : memref<1x6x256xf32, #tpu.memory_space<vmem>>, vector<1x3x256xf32>
    %46 = vector.shape_cast %45 : vector<1x3x256xf32> to vector<3x256xf32>
    %47 = vector.shape_cast %44 : vector<3x256xf32> to vector<1x3x256xf32>
    tpu.vector_store %arg7[%c0_23, %c3, %c0_24], %47 {strides = array<i32>} : memref<1x6x256xf32, #tpu.memory_space<vmem>>, vector<1x3x256xf32>,
    return
  }
  func.func @transform_0(%arg0: i32, %arg1: i32) -> (i32, i32, i32) {
    %c0_i32 = arith.constant 0 : i32
    %c0_i32_0 = arith.constant 0 : i32
    return %arg0, %c0_i32, %arg1 : i32, i32, i32
  }
  func.func @transform_1(%arg0: i32, %arg1: i32) -> (i32, i32) {
    %c0_i32 = arith.constant 0 : i32
    %c0_i32_0 = arith.constant 0 : i32
    %c0_i32_1 = arith.constant 0 : i32
    return %c0_i32, %c0_i32_0 : i32, i32
  }
  func.func @transform_2(%arg0: i32, %arg1: i32) -> (i32, i32) {
    %c0_i32 = arith.constant 0 : i32
    %c0_i32_0 = arith.constant 0 : i32
    %c0_i32_1 = arith.constant 0 : i32
    return %c0_i32, %c0_i32_0 : i32, i32
  }
  func.func @transform_3(%arg0: i32, %arg1: i32) -> (i32, i32) {
    %c0_i32 = arith.constant 0 : i32
    %c0_i32_0 = arith.constant 0 : i32
    %c0_i32_1 = arith.constant 0 : i32
    return %c0_i32, %c0_i32_0 : i32, i32
  }
  func.func @transform_4(%arg0: i32, %arg1: i32) -> (i32, i32) {
    %c0_i32 = arith.constant 0 : i32
    %c0_i32_0 = arith.constant 0 : i32
    %c0_i32_1 = arith.constant 0 : i32
    return %c0_i32, %c0_i32_0 : i32, i32
  }
  func.func @transform_5(%arg0: i32, %arg1: i32) -> (i32, i32, i32) {
    %c0_i32 = arith.constant 0 : i32
    %c0_i32_0 = arith.constant 0 : i32
    return %arg0, %c0_i32, %arg1 : i32, i32, i32
  }
  func.func @transform_6(%arg0: i32, %arg1: i32) -> (i32, i32, i32) {
    %c0_i32 = arith.constant 0 : i32
    %c0_i32_0 = arith.constant 0 : i32
    return %arg0, %c0_i32, %arg1 : i32, i32, i32
  }
}

</mosaic_0001>

<bundles_post_ra>
// kernel: tpu_custom_call.1
= control target key start
LH: loop header
LB: loop body
LE: loop exit
PB: predicated region body
PF: predicated region fallthrough
CT: control target
= control target key end

     0   :  { %12 = vsyncpa [#allocation3], 0  ;;  %s1109_s0 = inlined_call_operand.vmem [shape: f32[2,3,256], index: 0, kind: input, shape index: {}]   ;;  %s1110_s1 = inlined_call_operand.vmem [shape: f32[32,3], index: 1, kind: input, shape index: {}]   ;;  %s1111_s2 = inlined_call_operand.vmem [shape: f32[32,1], index: 2, kind: input, shape index: {}]   ;;  %s1112_s3 = inlined_call_operand.vmem [shape: f32[8,32], index: 3, kind: input, shape index: {}]   ;;  %s1113_s4 = inlined_call_operand.vmem [shape: f32[8,1], index: 4, kind: input, shape index: {}]   ;;  %s1114_s5 = inlined_call_operand.vmem [shape: f32[2,6,256], index: 5, kind: output, shape index: {0}]   ;;  %s1115_s6 = inlined_call_operand.hbm [shape: f32[2,2,256], index: 6, kind: output, shape index: {1}]  }
   0x1   :  { %14 = vsyncpa [#allocation3 + $0x1], 0  ;;  %s966_s21 = smov 0   ;;  %s968_s22 = smov 0  }
   0x2   :  { %s970_s23 = smov 0   ;;  %s972_s24 = smov 0  }
   0x3   :  { %s974_s25 = smov 0   ;;  %s976_s26 = smov 0  }
   0x4 LB: > { %s751_s27 = sadd.s32 4294967295, %s925_s26   ;;  %s752_s28 = sadd.s32 4294967294, %s925_s26   ;;  %s925_s26 = sphi %s976_s26, %s20_s26   ;;  %s921_s25 = sphi %s974_s25, %s1122_s25   ;;  %s917_s24 = sphi %s972_s24, %s1121_s24   ;;  %s913_s23 = sphi %s970_s23, %s1120_s23   ;;  %s909_s22 = sphi %s968_s22, %s1119_s22   ;;  %s905_s21 = sphi %s966_s21, %s1118_s21  }
   0x5   : > { %s32_s29 = sadd.s32 1, %s921_s25  ;;  %s181_s30 = sadd.s32 1, %s913_s23 }
   0x6   : > { %p34_p0 = scmp.ge.s32.totalorder %s32_s29, 2  ;;  %p191_p1 = scmp.ne.s32.totalorder %s913_s23, %s909_s22 }
   0x7   : > { %p192_p2 = scmp.eq.s32.totalorder %s751_s27, 1  ;;  %p197_p3 = scmp.ne.s32.totalorder %s909_s22, %s905_s21 }
   0x8   : > { %s1124_s29 = smov (%p34_p0, %s32_s29), 0  ;;  %p198_p5 = scmp.eq.s32.totalorder %s752_s28, 1 }
   0x9   : > { %p1006_p4 = por %p192_p2, %p191_p1  ;;  %s176_s8 = ssub.s32 %s921_s25, %s1124_s29 }
   0xa   : > { %p755_p6 = scmp.ge.s32.totalorder %s925_s26, 1  ;;  %p179_p7 = scmp.eq.s32.totalorder %s176_s8, 0 }
   0xb   : > { %p1013_p8 = por %p198_p5, %p197_p3  ;;  %p241_p9 = scmp.lt.s32.totalorder %s925_s26, 3 }
   0xc   : > { %s1019_s10 = scalar_select %p179_p7, %s913_s23, %s181_s30  }
   0xd   : > { %p242_p10 = pnand %p755_p6, %p241_p9 }
   0xe   : > { %p285_p11 = scmp.lt.s32.totalorder (!%p242_p10), %s917_s24, 1 }
   0xf   : > { %245 = sbr.rel (%p242_p10) target bundleno = 507 (0x1fb), region = 40 }
  0x14   : > { %v927_v0 = vmov 0.0   ;;  %v311_v1 = vld [vmem:[%s1111_s2 + $0x8] sm:$0xff]  ;;  %s1026_s13 = scalar_select %p285_p11, %s917_s24, 1  ;;  %v928_v2 = vmov 0   ;;  %v313_v3 = vld [vmem:[%s1111_s2 + $0x18] sm:$0xff]  ;;  %v310_v4 = vld [vmem:[%s1111_s2] sm:$0xff]  ;;  %v577_v60 = vlaneseq }
  0x15   : > { %418 = vmatprep.mubr.f32.mxu0 %v927_v0  ;;  %526 = vmatprep.mubr.f32.mxu1 %v927_v0  ;;  %v312_v5 = vld [vmem:[%s1111_s2 + $0x10] sm:$0xff]  ;;  %vm349_vm0 = vcmask 1042432   ;;  %v306_v8 = vld [vmem:[%s1110_s1] sm:$0xff]  ;;  %vm336_vm1 = vcmask 23552   ;;  %v307_v10 = vld [vmem:[%s1110_s1 + $0x8] sm:$0xff]  ;;  %vm458_vm2 = vcmask 261120  }
  0x16   : > { %835 = vset.pattern.permute.xlu1 %v928_v2  ;;  %834 = vset.pattern.permute.xlu0 %v928_v2  ;;  %s773_s16 = sshll.u32 %s1026_s13, 3  ;;  %v452_v9 = vld [vmem:[%s1113_s4] sm:$0xff]  ;;  %v308_v11 = vld [vmem:[%s1110_s1 + $0x10] sm:$0xff]  ;;  %v309_v12 = vld [vmem:[%s1110_s1 + $0x18] sm:$0xff]  ;;  %v578_v63 = vshrl.u32 %v577_v60, 7  ;;  %s774_s8 = sshll.u32 %s1026_s13, 4 }
  0x17   : > { %321 = vperm.xlu1 %835, %v311_v1   ;;  %331 = vperm.xlu0 %834, %v313_v3   ;;  %s292_s30 = scalar_lea.vmem %s1109_s0, %s773_s16  ;;  %v451_v41 = vld [vmem:[%s1112_s3] sm:$0xff]  ;;  %v929_v2 = vmov 1983009808   ;;  %s302_s15 = scalar_lea.vmem %s1114_s5, %s774_s8 }
  0x18   : > { %v305_v6 = vld [vmem:[%s292_s30] sm:$0x77]  ;;  %v575_v3 = vunpack.c.l.s4 %v929_v2  ;;  %s281_s30 = sand.u32 1, %s909_s22   ;;  %s775_s13 = sshll.u32 %s917_s24, 6 }
  0x19   : > { %v335_v7 = vcombine.high %v305_v6, %v305_v6  ;;  %s1063_s11 = sshll.u32 %s281_s30, 2  ;;  %s636_s20 = scalar_lea.hbm %s1115_s6, %s775_s13 }
  0x1a   : > { %s283_s16 = scalar_lea.vmem [#allocation2], %s1063_s11  ;;  %s618_s27 = scalar_lea.sflag [#allocation3], %s281_s30 }
  0x1b   : > { %316 = vperm.xlu1 %835, %v310_v4   ;;  %326 = vperm.xlu0 %834, %v312_v5   ;;  %s638_s17 = sshll.u32 %s283_s16, 4  ;;  %s930_s24 = smov [#allocation2]   ;;  %s639_s17 = int_to_ptr.vmem [resolvable:$true] %s638_s17 }
  0x1c   : > { %761 = vmatprep.subr.msk.mxu0 %vm349_vm0, %v335_v7  ;;  %s849_s28 = scalar_lea.vmem %s639_s17, 64  ;;  %s853_s8 = sshll.u32 %s930_s24, 4  ;;  %s854_s8 = int_to_ptr.vmem [resolvable:$false] %s853_s8 }
  0x1d   : > { %762 = vmatpush1.msk.msra.mxu0 %vm349_vm0, %v305_v6  ;;  %p850_p12 = scmp.ne.s32.totalorder %s639_s17, %s849_s28  ;;  %s855_s11 = scalar_lea.vmem %s854_s8, 128 }
  0x1e   : > { %763 = vmatmul.mubr.msk.f32.vlgmr.msra.gmra.mxu0 %vm336_vm1, %v306_v8  ;;  %v586_v8 = vsub.s32 6, %v578_v63  ;;  %p856_p1 = scmp.lt.s32.totalorder %s639_s17, %s854_s8  ;;  %p857_p2 = scmp.lt.s32.totalorder %s855_s11, %s849_s28 }
  0x1f   : > { %455 = vperm.xlu0 %834, %v452_v9   ;;  %424 = vmatprep.mubr.f32.mxu0 %v927_v0  ;;  %p851_p13 = pnand %p850_p12, %p1006_p4 }
  0x20   : > { %p858_p3 = por %p857_p2, %p856_p1 }
  0x21   : > { %p852_p0 = pneg %p851_p13 }
  0x22   : > { %764 = vmatmul.mubr.msk.f32.gmra.mxu0 %vm336_vm1, %v307_v10 }
  0x23   : > { %430 = vmatprep.mubr.f32.mxu0 %v927_v0  ;;  %p859_p5 = pnand %p858_p3, %p852_p0 }
  0x26   : > { %765 = vmatmul.mubr.msk.f32.gmra.mxu0 %vm336_vm1, %v308_v11 }
  0x27   : > { %436 = vmatprep.mubr.f32.mxu0 %v927_v0 }
  0x2a   : > { %766 = vmatmul.mubr.msk.f32.gmra.mxu0 %vm336_vm1, %v309_v12 }
  0x92   : > { %v332_v17 = vpop.permute.xlu0 %331  ;;  %v322_v20 = vpop.permute.xlu1 %321 }
  0x96   : > { %v327_v22 = vpop.permute.xlu0 %326  ;;  %v317_v28 = vpop.permute.xlu1 %316 }
  0x9a   : > { %v456_v42 = vpop.permute.xlu0 %455 }
  0xde   : > { %v420_v13 = vpop.f32.mrf.mxu0 }
  0xdf   : > { %v421_v35 = vadd.f32 %v420_v13, %v317_v28  ;;  %v598_v13 = vsub.s32 7, %v578_v63 }
  0xe0   : > { %v422_v14 = vpop.f32.mrf.mxu0 }
  0xe1   : > { %v423_v33 = vadd.f32 %v422_v14, %v317_v28  ;;  %v443_v40 = vmax.f32 %v421_v35, 0.0 }
  0xe2   : > { %v426_v15 = vpop.f32.mrf.mxu0 }
  0xe3   : > { %v427_v31 = vadd.f32 %v426_v15, %v322_v20  ;;  %v444_v39 = vmax.f32 %v423_v33, 0.0 }
  0xe4   : > { %v428_v16 = vpop.f32.mrf.mxu0 }
  0xe5   : > { %v429_v29 = vadd.f32 %v428_v16, %v322_v20  ;;  %v445_v38 = vmax.f32 %v427_v31, 0.0  ;;  %v576_v16 = vunpack.c.0.s8 %v575_v3 }
  0xe6   : > { %v432_v18 = vpop.f32.mrf.mxu0 }
  0xe7   : > { %v433_v27 = vadd.f32 %v432_v18, %v327_v22  ;;  %v446_v37 = vmax.f32 %v429_v29, 0.0 }
  0xe8   : > { %v434_v19 = vpop.f32.mrf.mxu0 }
  0xe9   : > { %v435_v25 = vadd.f32 %v434_v19, %v327_v22  ;;  %v447_v36 = vmax.f32 %v433_v27, 0.0  ;;  %v579_v27 = vsub.s32 %v576_v16, %v578_v63 }
  0xea   : > { %v438_v21 = vpop.f32.mrf.mxu0 }
  0xeb   : > { %v439_v23 = vadd.f32 %v438_v21, %v332_v17  ;;  %v448_v34 = vmax.f32 %v435_v25, 0.0 }
  0xec   : > { %v440_v24 = vpop.f32.mrf.mxu0 }
  0xed   : > { %v441_v26 = vadd.f32 %v440_v24, %v332_v17  ;;  %v449_v32 = vmax.f32 %v439_v23, 0.0 }
  0xef   : > { %v450_v30 = vmax.f32 %v441_v26, 0.0 }
  0xf1   : > { %486 = vmatprep.subr.mxu1 %v450_v30 }
  0xf2   : > { %487 = vmatpush1.msra.mxu1 %v449_v32 }
  0xf3   : > { %488 = vmatprep.subr.mxu1 %v448_v34 }
  0xf4   : > { %489 = vmatpush1.msra.mxu1 %v447_v36 }
  0xf5   : > { %490 = vmatprep.subr.mxu1 %v446_v37 }
  0xf6   : > { %491 = vmatpush1.msra.mxu1 %v445_v38 }
  0xf7   : > { %492 = vmatprep.subr.mxu1 %v444_v39 }
  0xf8   : > { %493 = vmatpush1.msra.mxu1 %v443_v40 }
  0xf9   : > { %767 = vmatmul.mubr.msk.f32.vlgmr.msra.gmra.mxu1 %vm458_vm2, %v451_v41 }
 0x1b9   : > { %v528_v43 = vpop.f32.mrf.mxu1 }
 0x1ba   : > { %v529_v44 = vadd.f32 %v528_v43, %v456_v42 }
 0x1bb   : > { %v530_v45 = vpop.f32.mrf.mxu1 }
 0x1bc   : > { %v543_v46 = vand.u32 2147483647, %v529_v44  ;;  %v531_v47 = vadd.f32 %v530_v45, %v456_v42  ;;  %v533_v53 = vmul.f32 0.5, %v529_v44  ;;  %v541_v12 = vmax.f32 %v529_v44, 0.0 }
 0x1be   : > { %v545_v48 = vsub.f32 0.0, %v543_v46  ;;  %v544_v49 = vand.u32 2147483647, %v531_v47  ;;  %v534_v56 = vmul.f32 0.5, %v531_v47  ;;  %v542_v21 = vmax.f32 %v531_v47, 0.0 }
 0x1c0   : > { %v547_v50 = vmul.f32 1.442695, %v545_v48  ;;  %v546_v51 = vsub.f32 0.0, %v544_v49 }
 0x1c2   : > { %837 = vpow2.f32 %v547_v50  ;;  %v549_v52 = vmul.f32 1.442695, %v546_v51 }
 0x1c4   : > { %839 = vpow2.f32 %v549_v52 }
 0x1c5   : > { %841 = vtanh.f32 %v533_v53 }
 0x1cf   : > { %v838_v54 = vpop.eup %837 }
 0x1d0   : > { %v551_v55 = vadd.f32 1.0, %v838_v54  ;;  %v554_v59 = vmul.f32 -0.5, %v838_v54  ;;  %v557_v0 = vand.u32 2147483647, %v838_v54 }
 0x1d1   : > { %v840_v57 = vpop.eup %839 }
 0x1d2   : > { %843 = vlog2.f32 %v551_v55  ;;  %v560_v58 = vadd.f32 1.0, %v840_v57  ;;  %v563_v61 = vmul.f32 -0.5, %v840_v57  ;;  %v555_v62 = vadd.f32 1.0, %v554_v59  ;;  %v842_v1 = vpop.eup %841 }
 0x1d3   : > { %845 = vtanh.f32 %v534_v56  ;;  %v566_v9 = vand.u32 2147483647, %v840_v57  ;;  %v537_v11 = vmul.f32 0.5, %v842_v1  ;;  %vm558_vm3 = vcmp.lt.f32.partialorder %v557_v0, 0.0004427343 }
 0x1d4   : > { %847 = vlog2.f32 %v560_v58  ;;  %v564_v5 = vadd.f32 1.0, %v563_v61  ;;  %v556_v7 = vmul.f32 %v838_v54, %v555_v62 }
 0x1d5   : > { %vm567_vm4 = vcmp.lt.f32.partialorder %v566_v9, 0.0004427343  ;;  %v539_v22 = vadd.f32 0.5, %v537_v11 }
 0x1d6   : > { %v565_v19 = vmul.f32 %v840_v57, %v564_v5 }
 0x1df   : > { %v844_v4 = vpop.eup %843 }
 0x1e0   : > { %v553_v6 = vmul.f32 0.6931472, %v844_v4  ;;  %v846_v10 = vpop.eup %845 }
 0x1e1   : > { %v848_v14 = vpop.eup %847  ;;  %v538_v20 = vmul.f32 0.5, %v846_v10 }
 0x1e2   : > { %v559_v15 = vsel %vm558_vm3, %v556_v7, %v553_v6  ;;  %v562_v18 = vmul.f32 0.6931472, %v848_v14 }
 0x1e3   : > { %v569_v17 = vadd.f32 %v559_v15, %v541_v12  ;;  %v540_v30 = vadd.f32 0.5, %v538_v20 }
 0x1e4   : > { %v568_v25 = vsel %vm567_vm4, %v565_v19, %v562_v18 }
 0x1e5   : > { %v587_v23 = vrot.slane %v569_v17, %v586_v8  ;;  %v599_v24 = vrot.slane %v569_v17, %v598_v13  ;;  %v570_v26 = vadd.f32 %v568_v25, %v542_v21 }
 0x1e7   : > { %v592_v28 = vmul.f32 %v587_v23, %v539_v22  ;;  %v604_v29 = vmul.f32 %v599_v24, %v539_v22  ;;  %v591_v31 = vrot.slane %v570_v26, %v586_v8  ;;  %v603_v32 = vrot.slane %v570_v26, %v598_v13 }
 0x1e8   : > { %v573_v33 = vcombine.high %v569_v17, %v570_v26 }
 0x1e9   : > { %594 = vst [vmem:[%s302_s15] sm:$0x7] %v592_v28  ;;  %606 = vst [vmem:[%s302_s15] sm:$0x38] %v604_v29  ;;  %v593_v34 = vmul.f32 %v591_v31, %v540_v30  ;;  %v605_v35 = vmul.f32 %v603_v32, %v540_v30 }
 0x1ea   : > { %v580_v36 = vrot.slane %v573_v33, %v579_v27 }
 0x1eb   : > { %595 = vst [vmem:[%s302_s15 + $0x8] sm:$0x7] %v593_v34  ;;  %607 = vst [vmem:[%s302_s15 + $0x8] sm:$0x38] %v605_v35 }
 0x1ec   : > { %v581_v37 = vcombine.high %v580_v36, %v580_v36 }
 0x1ee   : > { %583 = vst [vmem:[%s283_s16] sm:$0xf] %v581_v37 }
 0x1ef   : > { %862 = shalt.err (!%p859_p5)
}
 0x1f0   : > { %s863_s12 = scalar_lea.hbm %s636_s20, 64  ;;  %s867_s15 = scalar_lea.hbm %s1115_s6, 128 }
 0x1f1   : > { %p864_p6 = scmp.ne.s32.totalorder %s636_s20, %s863_s12  ;;  %p868_p10 = scmp.lt.s32.totalorder %s636_s20, %s1115_s6 }
 0x1f2   : > { %p869_p11 = scmp.lt.s32.totalorder %s867_s15, %s863_s12 }
 0x1f3   : > { %p865_p7 = pnand %p864_p6, %p1006_p4 }
 0x1f4   : > { %p870_p12 = por %p869_p11, %p868_p10 }
 0x1f5   : > { %p866_p9 = pneg %p865_p7 }
 0x1f7   : > { %p871_p13 = pnand %p870_p12, %p866_p9 }
 0x1f9   : > { %874 = shalt.err (!%p871_p13)
}
 0x1fa   : > { %776 = dma.vmem_to_hbm [thread:$0]  (%p1006_p4), %s639_s17, 64, %s636_s20, %s618_s27  }
 0x1fb PF: > { %p782_p0 = scmp.ge.s32.totalorder %s925_s26, 2  ;;  %s662_s18 = sand.u32 1, %s905_s21  }
 0x1fc   : > { %s663_s19 = scalar_lea.sflag [#allocation3], %s662_s18 }
 0x1fd   : > { %p779_p1 = pnand %p782_p0, %p1013_p8 }
 0x1ff   : > { %p780_p2 = pneg %p779_p1 }
 0x201   : > { %900 = dma.done.wait (%p780_p2), %s663_s19, 64  }
 0x202   : > { %902 = vsyncadd (%p780_p2), %s663_s19, 4294967232  ;;  %s20_s26 = sadd.s32 1, %s925_s26   ;;  %s1118_s21 = smov %s909_s22 }
 0x203   : > { %p17_p3 = scmp.ge.s32.totalorder %s20_s26, 4   ;;  %s1119_s22 = smov %s913_s23 }
 0x204   : > { %s1120_s23 = smov %s1019_s10  ;;  %s1121_s24 = smov %s921_s25 }
 0x205   : > { %s1122_s25 = smov %s1124_s29  ;;  %19 = sbr.rel (!%p17_p3) target bundleno = 4 (0x4), region = 87 }
 0x20a   :  { %668 = vsyncpa [#allocation3], 1 }
 0x20b   :  { %670 = vsyncpa [#allocation3 + $0x1], 1 }

</bundles_post_ra>
